<compile_context>
chip_gen: v7x
topology: tpu7x:2x2x1
jax: 0.10.0
libtpu: 0.0.40
codegen_flags: <defaults>
</compile_context>

<pallas_src>
import functools

import jax
import jax.numpy as jnp
import numpy as np
from jax import lax
from jax.experimental import pallas as pl
from jax.experimental.pallas import tpu as pltpu

_LANE = 128


def _round_up(v, m):
    return (v + m - 1) // m * m


def _pick_tile(padded, pref):
    """Largest multiple of 128 <= pref that divides `padded`."""
    t = max(min(pref, padded), _LANE)
    t -= t % _LANE
    while padded % t:
        t -= _LANE
    return t


def _chip_config():
    """Per-generation tile / VMEM sizing (review items: v5e/v6e vs v7x)."""
    row_tile, edge_tile, vmem = 512, 512, 48 * 1024 * 1024     # v7x-safe default
    try:
        info = pltpu.get_tpu_info()
        if info.vmem_capacity_bytes >= 100 * 1024 * 1024:       # v5e/v6e: 128 MiB
            row_tile, edge_tile, vmem = 1024, 1024, 96 * 1024 * 1024
    except Exception:  # interpret mode / unknown chip -> conservative defaults
        pass
    return row_tile, edge_tile, vmem


# ---------------------------------------------------------------------------
# Kernels
# ---------------------------------------------------------------------------
def _linear_kernel(apply_relu, emit_bf16, x_ref, w_ref, b_ref, *out_refs):
    """out = (relu)(x_bf16 @ W_bf16 + b_f32); optionally also emits a bf16 copy."""
    h = jnp.dot(x_ref[...], w_ref[...], preferred_element_type=jnp.float32)
    h = h + b_ref[...]
    if apply_relu:
        h = jnp.maximum(h, 0.0)
    out_refs[0][...] = h
    if emit_bf16:
        out_refs[1][...] = h.astype(jnp.bfloat16)


def _fused_layer_kernel(t_row, t_edge, tn, te, h_pad, p,
                        a_ref, hb_ref, hf_ref, dii_ref, dio_ref,
                        wl_ref, wr_ref, b_ref, dmat_ref, erow_ref,
                        outf_ref, outb_ref,
                        xa_scr, hg_scr, diffs_scr):
    """One G2 layer as a 3-phase sequential grid.

    Phase A (steps [0, t_row)):        conv + conv_gg for one row tile
    Phase B (steps [t_row, +t_edge)):  diffs = |h_gg[row] - h_gg[col]|^p
    Phase C (remaining t_row steps):   tau = tanh(scatter_mean(diffs, row));
                                       x_new = (1-tau)*x + tau*x_agg
    x_agg (f32), h_gg (bf16) and diffs (bf16) are VMEM scratch.
    """
    s = pl.program_id(0)

    # ---- phase A: both SAGEConvs for one row tile ---------------------------
    @pl.when(s < t_row)
    def _():
        agg = jnp.dot(a_ref[...], hb_ref[...],
                      preferred_element_type=jnp.float32)
        agg = (agg * dii_ref[...]).astype(jnp.bfloat16)        # mean agg (f32 recip)
        off = pl.multiple_of(s * tn, tn)
        root = hb_ref[pl.ds(off, tn), :]                       # resident bf16 h
        h2 = (jnp.dot(agg, wl_ref[...], preferred_element_type=jnp.float32)
              + jnp.dot(root, wr_ref[...], preferred_element_type=jnp.float32)
              + b_ref[...])
        h2 = jnp.maximum(h2, 0.0)                              # ReLU (both convs)
        xa_scr[pl.ds(off, tn), :] = h2[:, :h_pad]              # conv    -> x_agg
        hg_scr[pl.ds(off, tn), :] = h2[:, h_pad:].astype(jnp.bfloat16)  # conv_gg

    # ---- phase B: edge diffs via D = E_row - E_col --------------------------
    @pl.when(jnp.logical_and(s >= t_row, s < t_row + t_edge))
    def _():
        d = jnp.dot(dmat_ref[...], hg_scr[...],
                    preferred_element_type=jnp.float32)
        if p == 2.0:
            diffs = d * d                                      # VALU, no exp/log
        elif p == 1.0:
            diffs = jnp.abs(d)
        else:
            diffs = jnp.abs(d) ** p
        off = pl.multiple_of((s - t_row) * te, te)
        diffs_scr[pl.ds(off, te), :] = diffs.astype(jnp.bfloat16)

    # ---- phase C: scatter-mean over rows, tanh gate, blend ------------------
    @pl.when(s >= t_row + t_edge)
    def _():
        # E_row column tile contracted over the edge axis (transposed-LHS
        # matmul) -- no materialized E_row^T array.
        gg = lax.dot_general(erow_ref[...], diffs_scr[...],
                             dimension_numbers=(((0,), (0,)), ((), ())),
                             preferred_element_type=jnp.float32)
        tau = jnp.tanh(gg * dio_ref[...])
        off = pl.multiple_of((s - t_row - t_edge) * tn, tn)
        x_new = (1.0 - tau) * hf_ref[...] + tau * xa_scr[pl.ds(off, tn), :]
        outf_ref[...] = x_new
        outb_ref[...] = x_new.astype(jnp.bfloat16)


# ---------------------------------------------------------------------------
# pallas_call wrappers
# ---------------------------------------------------------------------------
def pallas_linear(x_bf16, w_bf16, b, *, relu, emit_bf16, tn, vmem_limit):
    n, k = x_bf16.shape
    m = w_bf16.shape[1]
    out_shape = [jax.ShapeDtypeStruct((n, m), jnp.float32)]
    out_specs = [pl.BlockSpec((tn, m), lambda i: (i, 0))]
    if emit_bf16:
        out_shape.append(jax.ShapeDtypeStruct((n, m), jnp.bfloat16))
        out_specs.append(pl.BlockSpec((tn, m), lambda i: (i, 0)))
    flops = 2 * n * k * m
    bytes_acc = n * k * 2 + k * m * 2 + m * 4 + n * m * (4 + (2 if emit_bf16 else 0))
    out = pl.pallas_call(
        functools.partial(_linear_kernel, relu, emit_bf16),
        out_shape=tuple(out_shape),
        grid=(n // tn,),
        in_specs=[
            pl.BlockSpec((tn, k), lambda i: (i, 0)),
            pl.BlockSpec((k, m), lambda i: (0, 0)),
            pl.BlockSpec((1, m), lambda i: (0, 0)),
        ],
        out_specs=tuple(out_specs),
        compiler_params=pltpu.CompilerParams(
            dimension_semantics=("parallel",),          # rows across TCs (v7x)
            vmem_limit_bytes=vmem_limit),
        cost_estimate=pl.CostEstimate(flops=int(flops), transcendentals=0,
                                      bytes_accessed=int(bytes_acc)),
    )(x_bf16, w_bf16, b)
    return out if emit_bf16 else out[0]


def pallas_fused_layer(h_f32, h_bf16, a_adj, d_mat, e_row,
                       inv_indeg, inv_outdeg, w_l, w_r, b_both,
                       *, p, tn, te, vmem_limit):
    n_pad, h_pad = h_f32.shape
    e_pad = d_mat.shape[0]
    t_row, t_edge = n_pad // tn, e_pad // te
    grid = (t_row + t_edge + t_row,)

    # Index maps hold a valid (clamped) block outside a given input's phase so
    # Pallas does not re-fetch it while the block index is unchanged.
    def a_idx(s):
        return (jnp.minimum(s, t_row - 1), 0)

    def hb_idx(s):
        return (0, 0)                                   # full bf16 h, resident

    def hf_idx(s):
        return (jnp.clip(s - (t_row + t_edge), 0, t_row - 1), 0)   # phase C rows

    def dii_idx(s):
        return (jnp.minimum(s, t_row - 1), 0)

    def dio_idx(s):
        return (jnp.clip(s - (t_row + t_edge), 0, t_row - 1), 0)

    def const_idx(s):
        return (0, 0)

    def dmat_idx(s):
        return (jnp.clip(s - t_row, 0, t_edge - 1), 0)

    def erow_idx(s):
        return (0, jnp.clip(s - (t_row + t_edge), 0, t_row - 1))

    def out_idx(s):
        return (jnp.clip(s - (t_row + t_edge), 0, t_row - 1), 0)

    flops = (2 * n_pad * n_pad * h_pad                  # neighbour aggregation
             + 4 * n_pad * h_pad * 2 * h_pad            # fused conv/conv_gg weights
             + 2 * e_pad * n_pad * h_pad                # edge-diff gather matmul
             + 2 * e_pad * n_pad * h_pad)               # scatter-mean matmul
    trans = n_pad * h_pad + (0 if p in (1.0, 2.0) else 2 * e_pad * h_pad)
    bytes_acc = (n_pad * n_pad * 2 + 2 * e_pad * n_pad * 2
                 + n_pad * h_pad * (2 + 4 + 4 + 2)
                 + 2 * h_pad * 2 * h_pad * 2 + 2 * h_pad * 4 + 2 * n_pad * 4)

    kernel = functools.partial(_fused_layer_kernel, t_row, t_edge, tn, te,
                               h_pad, float(p))
    return pl.pallas_call(
        kernel,
        out_shape=(jax.ShapeDtypeStruct((n_pad, h_pad), jnp.float32),
                   jax.ShapeDtypeStruct((n_pad, h_pad), jnp.bfloat16)),
        grid=grid,
        in_specs=[
            pl.BlockSpec((tn, n_pad), a_idx),           # adjacency counts (bf16)
            pl.BlockSpec((n_pad, h_pad), hb_idx),       # h (bf16, MXU operand)
            pl.BlockSpec((tn, h_pad), hf_idx),          # h (f32 carry, blend)
            pl.BlockSpec((tn, 1), dii_idx),             # 1 / in_deg  (f32)
            pl.BlockSpec((tn, 1), dio_idx),             # 1 / out_deg (f32)
            pl.BlockSpec((h_pad, 2 * h_pad), const_idx),  # [w_l | wg_l] bf16
            pl.BlockSpec((h_pad, 2 * h_pad), const_idx),  # [w_r | wg_r] bf16
            pl.BlockSpec((1, 2 * h_pad), const_idx),      # [b_conv | bg] f32
            pl.BlockSpec((te, n_pad), dmat_idx),        # D = E_row - E_col (bf16)
            pl.BlockSpec((e_pad, tn), erow_idx),        # E_row, column-tiled (bf16)
        ],
        out_specs=(pl.BlockSpec((tn, h_pad), out_idx),
                   pl.BlockSpec((tn, h_pad), out_idx)),
        scratch_shapes=[pltpu.VMEM((n_pad, h_pad), jnp.float32),    # x_agg
                        pltpu.VMEM((n_pad, h_pad), jnp.bfloat16),   # h_gg
                        pltpu.VMEM((e_pad, h_pad), jnp.bfloat16)],  # diffs
        compiler_params=pltpu.CompilerParams(
            dimension_semantics=("arbitrary",),         # phases are sequential
            vmem_limit_bytes=vmem_limit),
        cost_estimate=pl.CostEstimate(flops=int(flops), transcendentals=int(trans),
                                      bytes_accessed=int(bytes_acc)),
    )(a_adj, h_bf16, h_f32, inv_indeg, inv_outdeg, w_l, w_r, b_both, d_mat, e_row)


# ---------------------------------------------------------------------------
# Full G2_GNN forward (dropout probs are 0 / eval mode -> identity, omitted)
# ---------------------------------------------------------------------------
def g2_gnn_forward(x, edge_index, params, *, nlayers=2, p=2.0):
    n, f_in = x.shape
    hid = params["w_l"].shape[1]
    ncls = params["w_dec"].shape[1]
    e = edge_index.shape[1]

    row_pref, edge_pref, vmem_limit = _chip_config()

    # Pad rows/edges to the preferred-tile granularity (>= 512) so tiles do not
    # collapse to 128; feature dims to the 128-lane width.
    n_pad = _round_up(n, min(row_pref, 512))
    e_pad = _round_up(e, min(edge_pref, 512))
    f_pad = _round_up(f_in, _LANE)
    h_pad = _round_up(hid, _LANE)
    c_pad = _round_up(ncls, _LANE)

    tn = _pick_tile(n_pad, row_pref)
    te = _pick_tile(e_pad, edge_pref)
    # Row tile for the (row-parallel) encoder/decoder: prefer an even tile count
    # so v7x's two TensorCores get balanced work.
    tn_lin = _pick_tile(n_pad, row_pref)
    if n_pad // tn_lin == 1 and (n_pad // 2) % _LANE == 0:
        tn_lin = n_pad // 2

    # ---- structural (graph) matrices, built once in the wrapper -------------
    # TODO(synk): for realistically sparse graphs replace these dense one-hot /
    # adjacency matmuls with PrefetchScalarGridSpec index gathers + segment-sum
    # scatters (row/col indices in SMEM).
    pad_idx = jnp.full((e_pad - e,), n_pad, jnp.int32)       # -> all-zero one-hots
    row = jnp.concatenate([edge_index[0].astype(jnp.int32), pad_idx])
    col = jnp.concatenate([edge_index[1].astype(jnp.int32), pad_idx])
    e_row = jax.nn.one_hot(row, n_pad, dtype=jnp.float32)    # [Ep, Np]
    e_col = jax.nn.one_hot(col, n_pad, dtype=jnp.float32)    # [Ep, Np]
    a_adj = e_col.T @ e_row                                  # [Np, Np] edge counts
    d_mat = e_row - e_col                                    # [Ep, Np] in {-1,0,+1}
    inv_indeg = (1.0 / jnp.clip(jnp.sum(e_col, axis=0), 1.0))[:, None]   # f32
    inv_outdeg = (1.0 / jnp.clip(jnp.sum(e_row, axis=0), 1.0))[:, None]  # f32
    # bf16 is exact for 0/±1 and integer edge-multiplicity counts <= 256 (a
    # multigraph with >256 parallel edges between one pair would lose precision).
    a_adj = a_adj.astype(jnp.bfloat16)
    d_mat = d_mat.astype(jnp.bfloat16)
    e_row = e_row.astype(jnp.bfloat16)

    def pad2(a, r, c, dtype=jnp.float32):
        z = jnp.zeros((r, c), jnp.float32).at[:a.shape[0], :a.shape[1]].set(a)
        return z.astype(dtype)

    # bf16 weights: the MXU is bf16-native; accumulation stays f32, biases f32.
    w_enc = pad2(params["w_enc"], f_pad, h_pad, jnp.bfloat16)
    b_enc = pad2(params["b_enc"][None, :], 1, h_pad)
    w_dec = pad2(params["w_dec"], h_pad, c_pad, jnp.bfloat16)
    b_dec = pad2(params["b_dec"][None, :], 1, c_pad)

    # Stacked conv weights: output halves are [conv ; conv_gg].
    w_l = jnp.zeros((h_pad, 2 * h_pad), jnp.float32)
    w_l = w_l.at[:hid, :hid].set(params["w_l"])
    w_l = w_l.at[:hid, h_pad:h_pad + hid].set(params["wg_l"])
    w_r = jnp.zeros((h_pad, 2 * h_pad), jnp.float32)
    w_r = w_r.at[:hid, :hid].set(params["w_r"])
    w_r = w_r.at[:hid, h_pad:h_pad + hid].set(params["wg_r"])
    b_both = jnp.zeros((1, 2 * h_pad), jnp.float32)
    b_both = b_both.at[0, :hid].set(params["b_conv"])
    b_both = b_both.at[0, h_pad:h_pad + hid].set(params["bg"])
    w_l = w_l.astype(jnp.bfloat16)
    w_r = w_r.astype(jnp.bfloat16)

    x_pad = pad2(x, n_pad, f_pad, jnp.bfloat16)

    # ---- encoder: emits f32 carry + bf16 MXU copy ---------------------------
    h_f32, h_bf16 = pallas_linear(x_pad, w_enc, b_enc, relu=True, emit_bf16=True,
                                  tn=tn_lin, vmem_limit=vmem_limit)

    # ---- G2-gated SAGE layers: ONE fused pallas_call per layer --------------
    # Padded rows end up with h = relu(b_enc); they never contaminate real rows
    # because every adjacency / one-hot column of a padded node index is zero.
    for _ in range(nlayers):
        h_f32, h_bf16 = pallas_fused_layer(
            h_f32, h_bf16, a_adj, d_mat, e_row, inv_indeg, inv_outdeg,
            w_l, w_r, b_both, p=p, tn=tn, te=te, vmem_limit=vmem_limit)

    # ---- decoder -------------------------------------------------------------
    out = pallas_linear(h_bf16, w_dec, b_dec, relu=False, emit_bf16=False,
                        tn=tn_lin, vmem_limit=vmem_limit)
    return out[:n, :ncls]


# ---------------------------------------------------------------------------
# Pure-JAX f32 reference (segment gathers / scatters)
# ---------------------------------------------------------------------------
def g2_gnn_reference(x, edge_index, params, *, nlayers=2, p=2.0):
    n = x.shape[0]
    row, col = edge_index[0], edge_index[1]
    ones = jnp.ones((edge_index.shape[1],), jnp.float32)
    in_deg = jnp.clip(jnp.zeros((n,), jnp.float32).at[col].add(ones), 1.0)
    out_deg = jnp.clip(jnp.zeros((n,), jnp.float32).at[row].add(ones), 1.0)

    def sage(h, wl, wr, b):
        agg = jnp.zeros_like(h).at[col].add(h[row]) / in_deg[:, None]
        return agg @ wl + h @ wr + b

    h = jax.nn.relu(x @ params["w_enc"] + params["b_enc"])
    for _ in range(nlayers):
        xa = jax.nn.relu(sage(h, params["w_l"], params["w_r"], params["b_conv"]))
        hg = jax.nn.relu(sage(h, params["wg_l"], params["wg_r"], params["bg"]))
        diffs = jnp.abs(hg[row] - hg[col]) ** p
        gg = jnp.zeros_like(h).at[row].add(diffs) / out_deg[:, None]
        tau = jnp.tanh(gg)
        h = (1.0 - tau) * h + tau * xa
    return h @ params["w_dec"] + params["b_dec"]


if __name__ == "__main__":
    N, F_IN, HID, NCLASS, E, NLAYERS, P = 300, 16, 32, 5, 900, 2, 2.0

    key = jax.random.PRNGKey(0)
    ks = jax.random.split(key, 12)
    x = jax.random.normal(ks[0], (N, F_IN), jnp.float32)
    src = jax.random.randint(ks[1], (E,), 0, N, dtype=jnp.int32)
    dst = jax.random.randint(ks[2], (E,), 0, N, dtype=jnp.int32)
    edge_index = jnp.stack([src, dst])                         # [2, E]

    def glorot(k, shape, fan_in):
        return jax.random.normal(k, shape, jnp.float32) / jnp.sqrt(float(fan_in))

    params = dict(
        w_enc=glorot(ks[3], (F_IN, HID), F_IN),
        b_enc=0.1 * jax.random.normal(ks[4], (HID,), jnp.float32),
        w_l=glorot(ks[5], (HID, HID), HID),        # SAGEConv lin_l (aggregated)
        w_r=glorot(ks[6], (HID, HID), HID),        # SAGEConv lin_r (root)
        b_conv=0.1 * jax.random.normal(ks[7], (HID,), jnp.float32),
        wg_l=glorot(ks[8], (HID, HID), HID),       # conv_gg lin_l
        wg_r=glorot(ks[9], (HID, HID), HID),       # conv_gg lin_r
        bg=0.1 * jax.random.normal(ks[10], (HID,), jnp.float32),
        w_dec=glorot(ks[11], (HID, NCLASS), HID),
        b_dec=jnp.zeros((NCLASS,), jnp.float32),
    )

    out = jax.block_until_ready(
        g2_gnn_forward(x, edge_index, params, nlayers=NLAYERS, p=P))
    ref = g2_gnn_reference(x, edge_index, params, nlayers=NLAYERS, p=P)

    # Tolerance documents the INTENTIONAL bf16 mixed precision (bf16 weights,
    # bf16 matmul operands, bf16 hg/diffs) over 2 gated layers; reciprocals,
    # biases, tanh gate and the blend stay f32.
    np.testing.assert_allclose(np.asarray(out), np.asarray(ref),
                               rtol=1e-1, atol=1e-1)
    print("KERNEL_OK")
</pallas_src>

<mosaic_0001>
module attributes {stable_mosaic.version = 11 : i64} {
  func.func @_linear_kernel(%arg0: i32, %arg1: memref<256x128xbf16, #tpu.memory_space<vmem>>, %arg2: memref<128x128xbf16, #tpu.memory_space<vmem>>, %arg3: memref<1x128xf32, #tpu.memory_space<vmem>>, %arg4: memref<256x128xf32, #tpu.memory_space<vmem>>, %arg5: memref<256x128xbf16, #tpu.memory_space<vmem>>) attributes {dimension_semantics = [#tpu.dimension_semantics<parallel>], iteration_bounds = array<i64: 2>, scalar_prefetch = 0 : i64, scratch_operands = 0 : i64, tpu.core_type = #tpu.core_type<tc>, window_params = [{transform_indices = @transform_0, window_bounds = array<i64: 256, 128>}, {pipeline_mode = #tpu.pipeline_mode<synchronous>, transform_indices = @transform_1, window_bounds = array<i64: 128, 128>}, {pipeline_mode = #tpu.pipeline_mode<synchronous>, transform_indices = @transform_2, window_bounds = array<i64: 1, 128>}, {transform_indices = @transform_3, window_bounds = array<i64: 256, 128>}, {transform_indices = @transform_4, window_bounds = array<i64: 256, 128>}]} {
    %c0 = arith.constant 0 : index
    %c0_0 = arith.constant 0 : index
    %0 = vector.load %arg1[%c0, %c0_0] : memref<256x128xbf16, #tpu.memory_space<vmem>>, vector<256x128xbf16>
    %c0_1 = arith.constant 0 : index
    %c0_2 = arith.constant 0 : index
    %1 = vector.load %arg2[%c0_1, %c0_2] : memref<128x128xbf16, #tpu.memory_space<vmem>>, vector<128x128xbf16>
    %cst = arith.constant dense<0.000000e+00> : vector<256x128xf32>
    %2 = tpu.matmul %0, %1, %cst {dimension_numbers = #tpu.dot_dimension_numbers<[1], [0], [0], [1], [0, 0, 1, 1], [], []>} : vector<256x128xbf16>, vector<128x128xbf16>, vector<256x128xf32> -> vector<256x128xf32>
    %c0_3 = arith.constant 0 : index
    %c0_4 = arith.constant 0 : index
    %3 = vector.load %arg3[%c0_3, %c0_4] : memref<1x128xf32, #tpu.memory_space<vmem>>, vector<1x128xf32>
    %4 = vector.broadcast %3 : vector<1x128xf32> to vector<256x128xf32>
    %5 = arith.addf %2, %4 : vector<256x128xf32>
    %cst_5 = arith.constant 0.000000e+00 : f32
    %6 = vector.broadcast %cst_5 : f32 to vector<256x128xf32>
    %7 = arith.maximumf %5, %6 : vector<256x128xf32>
    %c0_6 = arith.constant 0 : index
    %c0_7 = arith.constant 0 : index
    %8 = vector.load %arg4[%c0_6, %c0_7] : memref<256x128xf32, #tpu.memory_space<vmem>>, vector<256x128xf32>
    tpu.vector_store %arg4[%c0_6, %c0_7], %7 {strides = array<i32>} : memref<256x128xf32, #tpu.memory_space<vmem>>, vector<256x128xf32>,
    %9 = arith.truncf %7 : vector<256x128xf32> to vector<256x128xbf16>
    %c0_8 = arith.constant 0 : index
    %c0_9 = arith.constant 0 : index
    %10 = vector.load %arg5[%c0_8, %c0_9] : memref<256x128xbf16, #tpu.memory_space<vmem>>, vector<256x128xbf16>
    tpu.vector_store %arg5[%c0_8, %c0_9], %9 {strides = array<i32>} : memref<256x128xbf16, #tpu.memory_space<vmem>>, vector<256x128xbf16>,
    return
  }
  func.func @transform_0(%arg0: i32) -> (i32, i32) {
    %c0_i32 = arith.constant 0 : i32
    %c0_i32_0 = arith.constant 0 : i32
    return %arg0, %c0_i32 : i32, i32
  }
  func.func @transform_1(%arg0: i32) -> (i32, i32) {
    %c0_i32 = arith.constant 0 : i32
    %c0_i32_0 = arith.constant 0 : i32
    %c0_i32_1 = arith.constant 0 : i32
    return %c0_i32, %c0_i32_0 : i32, i32
  }
  func.func @transform_2(%arg0: i32) -> (i32, i32) {
    %c0_i32 = arith.constant 0 : i32
    %c0_i32_0 = arith.constant 0 : i32
    %c0_i32_1 = arith.constant 0 : i32
    return %c0_i32, %c0_i32_0 : i32, i32
  }
  func.func @transform_3(%arg0: i32) -> (i32, i32) {
    %c0_i32 = arith.constant 0 : i32
    %c0_i32_0 = arith.constant 0 : i32
    return %arg0, %c0_i32 : i32, i32
  }
  func.func @transform_4(%arg0: i32) -> (i32, i32) {
    %c0_i32 = arith.constant 0 : i32
    %c0_i32_0 = arith.constant 0 : i32
    return %arg0, %c0_i32 : i32, i32
  }
}

</mosaic_0001>

<bundles_post_ra>
// kernel: tpu_custom_call.1
= control target key start
LH: loop header
LB: loop body
LE: loop exit
PB: predicated region body
PF: predicated region fallthrough
CT: control target
= control target key end

     0   :  { %10 = vsyncpa [#allocation3], 0  ;;  %s1917_s0 = inlined_call_operand.hbm [shape: bf16[512,128], index: 0, kind: input, shape index: {}]   ;;  %s1918_s1 = inlined_call_operand.hbm [shape: bf16[128,128], index: 1, kind: input, shape index: {}]   ;;  %s1919_s2 = inlined_call_operand.vmem [shape: f32[1,128], index: 2, kind: input, shape index: {}]   ;;  %s1920_s3 = inlined_call_operand.hbm [shape: f32[512,128], index: 3, kind: output, shape index: {0}]   ;;  %s1921_s4 = inlined_call_operand.hbm [shape: bf16[512,128], index: 4, kind: output, shape index: {1}]  }
   0x1   :  { %12 = vsyncpa [#allocation3 + $0x1], 0 }
   0x2   :  { %13 = vsyncpa [#allocation6], 0 }
   0x3   :  { %14 = vsyncpa [#allocation4], 0 }
   0x4   :  { %16 = vsyncpa [#allocation4 + $0x1], 0 }
   0x5   :  { %17 = vsyncpa [#allocation9], 0 }
   0x6   :  { %19 = vsyncpa [#allocation9 + $0x1], 0  ;;  %s1564_s15 = smov 0   ;;  %s1566_s16 = smov 0  }
   0x7   :  { %s1568_s17 = smov 0   ;;  %s1570_s18 = smov 0  }
   0x8 LB: > { %s1585_s19 = sadd.s32 4294967295, %s1527_s18   ;;  %s980_s20 = sadd.s32 4294967294, %s1527_s18   ;;  %s1527_s18 = sphi %s1570_s18, %s1941_s18   ;;  %s1523_s17 = sphi %s1568_s17, %s1940_s17   ;;  %s1519_s16 = sphi %s1566_s16, %s1939_s16   ;;  %s1515_s15 = sphi %s1564_s15, %s1938_s15  }
   0x9   : > { %p45_p0 = scmp.ne.s32.totalorder %s1519_s16, %s1515_s15  ;;  %p1922_p1 = scmp.eq.s32.totalorder %s1585_s19, 0 }
   0xa   : > { %p117_p3 = scmp.eq.s32.totalorder %s980_s20, 1  ;;  %p981_p5 = scmp.ge.s32.totalorder %s1527_s18, 1 }
   0xb   : > { %p1594_p4 = por %p1922_p1, %p45_p0  ;;  %p150_p7 = scmp.lt.s32.totalorder %s1527_s18, 3 }
   0xc   : > { %p1599_p6 = por %p117_p3, %p45_p0  ;;  %s1529_s24 = smov [#allocation5]  }
   0xd   : > { %s1925_s21 = scalar_select %p1594_p4, 1, 0 }
   0xe   : > { %s1926_s22 = scalar_select %p1599_p6, 1, 0 }
   0xf   : > { %p1604_p8 = pnand %p981_p5, %p150_p7  ;;  %s162_s25 = sshll.u32 %s1529_s24, 4  ;;  %s1608_s25 = int_to_ptr.vmem [resolvable:$true] %s162_s25 }
  0x10   : > { %s1620_s27 = sadd.s32 1, %s1527_s18   ;;  %s32_s28 = sadd.s32 1, %s1523_s17 }
  0x11   : > { %s1927_s23 = scalar_select %p1604_p8, 1, 0 }
  0x12   : > { %p1285_p9 = pneg %p1604_p8  ;;  %s29_s29 = ssub.s32 %s1527_s18, %s1620_s27 }
  0x13   : > { %s1367_s6 = scalar_lea.hbm %s1918_s1, 1024 }
  0x14   : > { %p1615_p11 = pnand %p1285_p9, %p1922_p1  ;;  %p1368_p12 = scmp.ne.s32.totalorder %s1918_s1, %s1367_s6 }
  0x15   : > { %p1374_p5 = scmp.lt.u32.totalorder %s1367_s6, %s1918_s1 }
  0x16   : > { %p1369_p13 = pneg %p1615_p11 }
  0x18   : > { %p1370_p0 = pnand %p1369_p13, %p1368_p12 }
  0x1a   : > { %p1371_p3 = pneg %p1370_p0 }
  0x1c   : > { %p1376_p7 = pnand %p1374_p5, %p1371_p3 }
  0x1e   : > { %1379 = shalt.err (!%p1376_p7)
}
  0x1f   : > { %s1380_s11 = scalar_lea.vmem %s1608_s25, 1024  ;;  %p1388_p2 = scmp.lt.s32.totalorder %s1608_s25, %s1608_s25 }
  0x20   : > { %p1381_p9 = scmp.ne.s32.totalorder %s1608_s25, %s1380_s11  ;;  %p1389_p6 = scmp.lt.s32.totalorder %s1380_s11, %s1380_s11 }
  0x22   : > { %p1383_p10 = pnand %p1381_p9, %p1369_p13  ;;  %p1390_p4 = por %p1389_p6, %p1388_p2 }
  0x24   : > { %p1384_p1 = pneg %p1383_p10 }
  0x26   : > { %p1391_p8 = pnand %p1390_p4, %p1384_p1 }
  0x28   : > { %1394 = shalt.err (!%p1391_p8)
}
  0x29   : > { %s1530_s12 = smov 64   ;;  %s1531_s13 = smov 4  }
  0x2a   : > { %1288 = dma.hbm_to_vmem [thread:$0]  (!%p1615_p11), %s1918_s1, 1024, %s1608_s25, [#allocation6], %s1530_s12, %s1530_s12, %s1531_s13  }
  0x2b   : > { %p30_p1 = scmp.eq.s32.totalorder %s29_s29, 0  ;;  %p39_p2 = scmp.ne.s32.totalorder %s1523_s17, %s1519_s16 }
  0x2c   : > { %p40_p4 = scmp.eq.s32.totalorder %s1527_s18, 0  ;;  %p1301_p6 = scmp.lt.s32.totalorder %s1527_s18, 2 }
  0x2d   : > { %s1654_s24 = scalar_select %p30_p1, %s1523_s17, %s32_s28  }
  0x2e   : > { %p41_p8 = por %p40_p4, %p39_p2  ;;  %p1929_p10 = scmp.eq.s32.totalorder %s1585_s19, 1 }
  0x2f   : > { %s179_s26 = sand.u32 1, %s1523_s17   ;;  %s1057_s5 = sshll.u32 %s1527_s18, 11 }
  0x30   : > { %p1658_p12 = por %p1929_p10, %p39_p2  ;;  %s984_s6 = sshll.u32 %s179_s26, 7 }
  0x31   : > { %s1667_s9 = scalar_lea.hbm %s1917_s0, %s1057_s5  ;;  %s183_s25 = scalar_lea.vmem [#allocation2], %s984_s6 }
  0x32   : > { %s190_s28 = sshll.u32 %s183_s25, 4  ;;  %p1669_p11 = pnand %p1301_p6, %p41_p8  ;;  %s1673_s28 = int_to_ptr.vmem [resolvable:$true] %s190_s28 }
  0x33   : > { %s1675_s10 = scalar_lea.sflag [#allocation3], %s179_s26  ;;  %s1395_s11 = scalar_lea.hbm %s1667_s9, 2048 }
  0x34   : > { %p1396_p13 = scmp.ne.s32.totalorder %s1667_s9, %s1395_s11  ;;  %p1397_p0 = pneg %p1669_p11 }
  0x35   : > { %s1400_s5 = scalar_lea.hbm %s1917_s0, 4096  ;;  %p1401_p7 = scmp.lt.u32.totalorder %s1667_s9, %s1917_s0 }
  0x36   : > { %p1398_p3 = pnand %p1397_p0, %p1396_p13  ;;  %p1402_p9 = scmp.lt.u32.totalorder %s1400_s5, %s1395_s11 }
  0x37   : > { %p1404_p2 = scmp.lt.u32.totalorder %s1395_s11, %s1667_s9 }
  0x38   : > { %p1399_p5 = pneg %p1398_p3  ;;  %p1403_p1 = por %p1402_p9, %p1401_p7 }
  0x3a   : > { %p1405_p4 = por %p1404_p2, %p1403_p1 }
  0x3c   : > { %p1406_p6 = pnand %p1405_p4, %p1399_p5 }
  0x3e   : > { %1409 = shalt.err (!%p1406_p6)
}
  0x3f   : > { %s1410_s26 = scalar_lea.vmem %s1673_s28, 2048  ;;  %s1532_s8 = smov [#allocation2]  }
  0x40   : > { %p1411_p8 = scmp.ne.s32.totalorder %s1673_s28, %s1410_s26  ;;  %s1415_s25 = sshll.u32 %s1532_s8, 4  ;;  %s1416_s25 = int_to_ptr.vmem [resolvable:$false] %s1415_s25 }
  0x41   : > { %s1417_s14 = scalar_lea.vmem %s1416_s25, 4096  ;;  %p1418_p3 = scmp.lt.s32.totalorder %s1673_s28, %s1416_s25 }
  0x42   : > { %p1413_p10 = pnand %p1411_p8, %p1397_p0  ;;  %p1419_p7 = scmp.lt.s32.totalorder %s1417_s14, %s1410_s26 }
  0x44   : > { %p1414_p13 = pneg %p1413_p10  ;;  %p1420_p9 = por %p1419_p7, %p1418_p3 }
  0x46   : > { %p1421_p1 = pnand %p1420_p9, %p1414_p13 }
  0x48   : > { %1424 = shalt.err (!%p1421_p1)
}
  0x49   : > { %1292 = dma.hbm_to_vmem [thread:$0]  (!%p1669_p11), %s1667_s9, 2048, %s1673_s28, %s1675_s10, %s1530_s12, %s1530_s12, %s1531_s13  }
  0x4a   : > { %p1932_p0 = scmp.ne.s32.totalorder %s1927_s23, 0 }
  0x4b   : > { %s1709_s11 = sand.u32 (!%p1932_p0), 1, %s1519_s16   ;;  %p1933_p5 = scmp.ne.s32.totalorder (!%p1932_p0), %s1925_s21, 0 }
  0x4c   : > { %202 = sbr.rel (%p1932_p0) target bundleno = 403 (0x193), region = 32  ;;  %s988_s20 = sshll.u32 (!%p1932_p0), %s1709_s11, 7 }
  0x4d   : > { %s205_s5 = scalar_lea.sflag (!%p1932_p0), [#allocation3], %s1709_s11  ;;  %s1715_s29 = scalar_lea.vmem (!%p1932_p0), [#allocation2], %s988_s20 }
  0x53   : > { %1498 = dma.done.wait (%p1933_p5), %s205_s5, 2048  }
  0x54   : > { %1500 = vsyncadd (%p1933_p5), %s205_s5, 4294965248  ;;  %p1934_p11 = scmp.eq.s32.totalorder %s1585_s19, 0 }
  0x56   : > { %1502 = dma.done.wait (%p1934_p11), [#allocation6], 1024   ;;  %p1935_p2 = pmov %p1934_p11 }
  0x57   : > { %v1343_v0 = vld [vmem:[#allocation5] sm:$0xff]   ;;  %v1344_v1 = vld [vmem:[#allocation5 + $0x8] sm:$0xff]   ;;  %v1345_v2 = vld [vmem:[#allocation5 + $0x10] sm:$0xff]   ;;  %s990_s12 = sshll.u32 %s1709_s11, 8  ;;  %s1767_s9 = scalar_lea.vmem [#allocation8], %s988_s20 }
  0x58   : > { %1504 = vsyncadd (%p1935_p2), [#allocation6], 4294966272  ;;  %1211 = vmatprep.subr.bf16.mxu0 %v1343_v0  ;;  %1259 = vmatprep.subr.bf16.mxu1 %v1343_v0  ;;  %v1346_v3 = vld [vmem:[#allocation5 + $0x18] sm:$0xff]   ;;  %v1351_v4 = vld [vmem:[%s1715_s29] sm:$0xff]   ;;  %s1755_s13 = scalar_lea.vmem [#allocation7], %s990_s12  ;;  %s1090_s28 = sshll.u32 %s1585_s19, 12 }
  0x59   : > { %1212 = vmatpush3.bf16.msra.mxu0 %v1343_v0  ;;  %1267 = vmatpush3.bf16.msra.mxu1 %v1343_v0  ;;  %v1352_v5 = vld [vmem:[%s1715_s29 + $0x40] sm:$0xff]   ;;  %v1348_v7 = vld [vmem:[#allocation5 + $0x28] sm:$0xff]   ;;  %v1349_v8 = vld [vmem:[#allocation5 + $0x30] sm:$0xff]   ;;  %s849_s10 = sshll.u32 %s1755_s13, 4  ;;  %s1824_s26 = scalar_lea.hbm %s1920_s3, %s1090_s28  ;;  %s1832_s10 = int_to_ptr.vmem [resolvable:$true] %s849_s10 }
  0x5a   : > { %1213 = vmatprep.subr.bf16.mxu0 %v1344_v1  ;;  %1260 = vmatprep.subr.bf16.mxu1 %v1344_v1  ;;  %v1347_v6 = vld [vmem:[#allocation5 + $0x20] sm:$0xff]   ;;  %v1350_v9 = vld [vmem:[#allocation5 + $0x38] sm:$0xff]   ;;  %v1353_v10 = vld [vmem:[%s1715_s29 + $0x8] sm:$0xff]   ;;  %s1091_s8 = sshll.u32 %s1585_s19, 11  ;;  %s865_s25 = sshll.u32 %s1767_s9, 4  ;;  %s1843_s25 = int_to_ptr.vmem [resolvable:$true] %s865_s25 }
  0x5b   : > { %1227 = vmatprep.mubr.bf16.mxu0 %v1351_v4  ;;  %1243 = vmatprep.mubr.bf16.mxu1 %v1352_v5  ;;  %v1354_v11 = vld [vmem:[%s1715_s29 + $0x48] sm:$0xff]   ;;  %v1355_v12 = vld [vmem:[%s1715_s29 + $0x10] sm:$0xff]   ;;  %v1357_v14 = vld [vmem:[%s1715_s29 + $0x18] sm:$0xff]   ;;  %s1841_s20 = scalar_lea.hbm %s1921_s4, %s1091_s8  ;;  %s831_s5 = scalar_lea.sflag [#allocation4], %s1709_s11 }
  0x5c   : > { %v1356_v13 = vld [vmem:[%s1715_s29 + $0x50] sm:$0xff]   ;;  %v1358_v15 = vld [vmem:[%s1715_s29 + $0x58] sm:$0xff]   ;;  %v1359_v16 = vld [vmem:[%s1715_s29 + $0x20] sm:$0xff]   ;;  %s1533_s21 = smov [#allocation7]  }
  0x5d   : > { %1214 = vmatpush3.bf16.msra.mxu0 %v1344_v1  ;;  %1268 = vmatpush3.bf16.msra.mxu1 %v1344_v1  ;;  %v1360_v17 = vld [vmem:[%s1715_s29 + $0x60] sm:$0xff]   ;;  %v1361_v18 = vld [vmem:[%s1715_s29 + $0x28] sm:$0xff]   ;;  %v1363_v20 = vld [vmem:[%s1715_s29 + $0x30] sm:$0xff]   ;;  %s1429_s23 = sshll.u32 %s1533_s21, 4  ;;  %s1430_s23 = int_to_ptr.vmem [resolvable:$false] %s1429_s23 }
  0x5e   : > { %1215 = vmatprep.subr.bf16.mxu0 %v1345_v2  ;;  %1261 = vmatprep.subr.bf16.mxu1 %v1345_v2  ;;  %v1362_v19 = vld [vmem:[%s1715_s29 + $0x68] sm:$0xff]   ;;  %v1364_v21 = vld [vmem:[%s1715_s29 + $0x70] sm:$0xff]   ;;  %v1365_v22 = vld [vmem:[%s1715_s29 + $0x38] sm:$0xff]   ;;  %s1431_s12 = scalar_lea.vmem %s1430_s23, 8192  ;;  %p1432_p10 = scmp.lt.s32.totalorder %s1832_s10, %s1430_s23 }
  0x5f   : > { %v1366_v23 = vld [vmem:[%s1715_s29 + $0x78] sm:$0xff]   ;;  %v1744_v24 = vld [vmem:[%s1919_s2] ss:$0 sm:$0xff]  ;;  %s1425_s29 = scalar_lea.vmem %s1832_s10, 4096 }
  0x60   : > { %p1426_p4 = scmp.ne.s32.totalorder %s1832_s10, %s1425_s29  ;;  %p1433_p13 = scmp.lt.s32.totalorder %s1431_s12, %s1425_s29 }
  0x61   : > { %1216 = vmatpush3.bf16.msra.mxu0 %v1345_v2  ;;  %1269 = vmatpush3.bf16.msra.mxu1 %v1345_v2 }
  0x62   : > { %1217 = vmatprep.subr.bf16.mxu0 %v1346_v3  ;;  %1262 = vmatprep.subr.bf16.mxu1 %v1346_v3  ;;  %p1427_p6 = pnand %p1426_p4, %p1658_p12  ;;  %p1434_p3 = por %p1433_p13, %p1432_p10 }
  0x64   : > { %p1428_p8 = pneg %p1427_p6 }
  0x65   : > { %1218 = vmatpush3.bf16.msra.mxu0 %v1346_v3  ;;  %1270 = vmatpush3.bf16.msra.mxu1 %v1346_v3 }
  0x66   : > { %1219 = vmatprep.subr.bf16.mxu0 %v1347_v6  ;;  %1263 = vmatprep.subr.bf16.mxu1 %v1347_v6  ;;  %p1435_p7 = pnand %p1434_p3, %p1428_p8 }
  0x69   : > { %1220 = vmatpush3.bf16.msra.mxu0 %v1347_v6  ;;  %1271 = vmatpush3.bf16.msra.mxu1 %v1347_v6 }
  0x6a   : > { %1221 = vmatprep.subr.bf16.mxu0 %v1348_v7  ;;  %1264 = vmatprep.subr.bf16.mxu1 %v1348_v7 }
  0x6d   : > { %1222 = vmatpush3.bf16.msra.mxu0 %v1348_v7  ;;  %1272 = vmatpush3.bf16.msra.mxu1 %v1348_v7 }
  0x6e   : > { %1223 = vmatprep.subr.bf16.mxu0 %v1349_v8  ;;  %1265 = vmatprep.subr.bf16.mxu1 %v1349_v8 }
  0x71   : > { %1224 = vmatpush3.bf16.msra.mxu0 %v1349_v8  ;;  %1273 = vmatpush3.bf16.msra.mxu1 %v1349_v8 }
  0x72   : > { %1225 = vmatprep.subr.bf16.mxu0 %v1350_v9  ;;  %1266 = vmatprep.subr.bf16.mxu1 %v1350_v9 }
  0x75   : > { %1226 = vmatpush3.bf16.msra.mxu0 %v1350_v9  ;;  %1274 = vmatpush3.bf16.msra.mxu1 %v1350_v9 }
  0x78   : > { %1228 = vmatmul.mubr.bf16.vlgmr.msra.gmra.mrb[0].mxu0 %v1353_v10  ;;  %1244 = vmatmul.mubr.bf16.vlgmr.msra.gmra.mrb[0].mxu1 %v1354_v11 }
  0x79   : > { %1231 = vmatprep.mubr.bf16.mxu0 %v1355_v12  ;;  %1247 = vmatprep.mubr.bf16.mxu1 %v1356_v13 }
  0x80   : > { %1232 = vmatmul.mubr.bf16.gmra.mrb[4].mxu0 %v1357_v14  ;;  %1248 = vmatmul.mubr.bf16.gmra.mrb[4].mxu1 %v1358_v15 }
  0x81   : > { %1235 = vmatprep.mubr.bf16.mxu0 %v1359_v16  ;;  %1251 = vmatprep.mubr.bf16.mxu1 %v1360_v17 }
  0x88   : > { %1236 = vmatmul.mubr.bf16.gmra.mrb[8].mxu0 %v1361_v18  ;;  %1252 = vmatmul.mubr.bf16.gmra.mrb[8].mxu1 %v1362_v19 }
  0x89   : > { %1239 = vmatprep.mubr.bf16.mxu0 %v1363_v20  ;;  %1255 = vmatprep.mubr.bf16.mxu1 %v1364_v21 }
  0x90   : > { %1240 = vmatmul.mubr.bf16.gmra.mrb[12].mxu0 %v1365_v22  ;;  %1256 = vmatmul.mubr.bf16.gmra.mrb[12].mxu1 %v1366_v23 }
 0x14b   : > { %v1229_v25 = vpop.f32.mrb[0].mxu0  ;;  %v1245_v26 = vpop.f32.mrb[0].mxu1 }
 0x14c   : > { %v488_v27 = vadd.f32 %v1229_v25, %v1744_v24  ;;  %v552_v28 = vadd.f32 %v1245_v26, %v1744_v24  ;;  %v479_v29 = vpop.f32.mrb[1].mxu0  ;;  %v543_v30 = vpop.f32.mrb[1].mxu1 }
 0x14d   : > { %v480_v31 = vadd.f32 %v1744_v24, %v479_v29  ;;  %v544_v32 = vadd.f32 %v1744_v24, %v543_v30  ;;  %v1230_v33 = vpop.f32.mrb[2].mxu0  ;;  %v1246_v34 = vpop.f32.mrb[2].mxu1 }
 0x14e   : > { %v608_v35 = vmax.f32 %v488_v27, 0.0  ;;  %v624_v36 = vmax.f32 %v552_v28, 0.0  ;;  %v491_v37 = vadd.f32 %v1230_v33, %v1744_v24  ;;  %v555_v38 = vadd.f32 %v1246_v34, %v1744_v24  ;;  %v482_v39 = vpop.f32.mrb[3].mxu0  ;;  %v546_v40 = vpop.f32.mrb[3].mxu1 }
 0x14f   : > { %v606_v41 = vmax.f32 %v480_v31, 0.0  ;;  %v622_v42 = vmax.f32 %v544_v32, 0.0  ;;  %v483_v43 = vadd.f32 %v1744_v24, %v482_v39  ;;  %v547_v44 = vadd.f32 %v1744_v24, %v546_v40 }
 0x150   : > { %640 = vst [vmem:[%s1755_s13 + $0x10] sm:$0xff] %v608_v35  ;;  %656 = vst [vmem:[%s1755_s13 + $0x90] sm:$0xff] %v624_v36  ;;  %v609_v45 = vmax.f32 %v491_v37, 0.0  ;;  %v625_v46 = vmax.f32 %v555_v38, 0.0 }
 0x151   : > { %638 = vst [vmem:[%s1755_s13] sm:$0xff] %v606_v41  ;;  %654 = vst [vmem:[%s1755_s13 + $0x80] sm:$0xff] %v622_v42  ;;  %v607_v47 = vmax.f32 %v483_v43, 0.0  ;;  %v623_v48 = vmax.f32 %v547_v44, 0.0 }
 0x152   : > { %641 = vst [vmem:[%s1755_s13 + $0x18] sm:$0xff] %v609_v45  ;;  %v1100_v49 = vpack.c.bf16 %v609_v45, %v608_v35  ;;  %657 = vst [vmem:[%s1755_s13 + $0x98] sm:$0xff] %v625_v46  ;;  %v1140_v50 = vpack.c.bf16 %v625_v46, %v624_v36 }
 0x153   : > { %639 = vst [vmem:[%s1755_s13 + $0x8] sm:$0xff] %v607_v47  ;;  %v1095_v51 = vpack.c.bf16 %v607_v47, %v606_v41  ;;  %655 = vst [vmem:[%s1755_s13 + $0x88] sm:$0xff] %v623_v48  ;;  %v1135_v52 = vpack.c.bf16 %v623_v48, %v622_v42  ;;  %v1233_v53 = vpop.f32.mrb[4].mxu0  ;;  %v1249_v54 = vpop.f32.mrb[4].mxu1 }
 0x154   : > { %1172 = vst [vmem:[%s1767_s9 + $0x8] sm:$0xff] %v1100_v49   ;;  %1180 = vst [vmem:[%s1767_s9 + $0x48] sm:$0xff] %v1140_v50   ;;  %v504_v55 = vadd.f32 %v1233_v53, %v1744_v24  ;;  %v568_v56 = vadd.f32 %v1249_v54, %v1744_v24  ;;  %v495_v57 = vpop.f32.mrb[5].mxu0  ;;  %v559_v58 = vpop.f32.mrb[5].mxu1 }
 0x155   : > { %1096 = vst [vmem:[%s1767_s9] sm:$0xff] %v1095_v51   ;;  %1179 = vst [vmem:[%s1767_s9 + $0x40] sm:$0xff] %v1135_v52   ;;  %v496_v59 = vadd.f32 %v1744_v24, %v495_v57  ;;  %v560_v60 = vadd.f32 %v1744_v24, %v559_v58  ;;  %v1234_v61 = vpop.f32.mrb[6].mxu0  ;;  %v1250_v62 = vpop.f32.mrb[6].mxu1 }
 0x156   : > { %v612_v63 = vmax.f32 %v504_v55, 0.0  ;;  %v628_v0 = vmax.f32 %v568_v56, 0.0  ;;  %v507_v1 = vadd.f32 %v1234_v61, %v1744_v24  ;;  %v571_v2 = vadd.f32 %v1250_v62, %v1744_v24  ;;  %v498_v3 = vpop.f32.mrb[7].mxu0  ;;  %v562_v4 = vpop.f32.mrb[7].mxu1 }
 0x157   : > { %v610_v5 = vmax.f32 %v496_v59, 0.0  ;;  %v626_v6 = vmax.f32 %v560_v60, 0.0  ;;  %v499_v7 = vadd.f32 %v1744_v24, %v498_v3  ;;  %v563_v8 = vadd.f32 %v1744_v24, %v562_v4 }
 0x158   : > { %644 = vst [vmem:[%s1755_s13 + $0x30] sm:$0xff] %v612_v63  ;;  %660 = vst [vmem:[%s1755_s13 + $0xb0] sm:$0xff] %v628_v0  ;;  %v613_v9 = vmax.f32 %v507_v1, 0.0  ;;  %v629_v10 = vmax.f32 %v571_v2, 0.0 }
 0x159   : > { %642 = vst [vmem:[%s1755_s13 + $0x20] sm:$0xff] %v610_v5  ;;  %658 = vst [vmem:[%s1755_s13 + $0xa0] sm:$0xff] %v626_v6  ;;  %v611_v11 = vmax.f32 %v499_v7, 0.0  ;;  %v627_v12 = vmax.f32 %v563_v8, 0.0 }
 0x15a   : > { %645 = vst [vmem:[%s1755_s13 + $0x38] sm:$0xff] %v613_v9  ;;  %v1110_v13 = vpack.c.bf16 %v613_v9, %v612_v63  ;;  %661 = vst [vmem:[%s1755_s13 + $0xb8] sm:$0xff] %v629_v10  ;;  %v1150_v14 = vpack.c.bf16 %v629_v10, %v628_v0 }
 0x15b   : > { %643 = vst [vmem:[%s1755_s13 + $0x28] sm:$0xff] %v611_v11  ;;  %v1105_v15 = vpack.c.bf16 %v611_v11, %v610_v5  ;;  %659 = vst [vmem:[%s1755_s13 + $0xa8] sm:$0xff] %v627_v12  ;;  %v1145_v16 = vpack.c.bf16 %v627_v12, %v626_v6  ;;  %v1237_v17 = vpop.f32.mrb[8].mxu0  ;;  %v1253_v18 = vpop.f32.mrb[8].mxu1 }
 0x15c   : > { %1174 = vst [vmem:[%s1767_s9 + $0x18] sm:$0xff] %v1110_v13   ;;  %1182 = vst [vmem:[%s1767_s9 + $0x58] sm:$0xff] %v1150_v14   ;;  %v520_v19 = vadd.f32 %v1237_v17, %v1744_v24  ;;  %v584_v20 = vadd.f32 %v1253_v18, %v1744_v24  ;;  %v511_v21 = vpop.f32.mrb[9].mxu0  ;;  %v575_v22 = vpop.f32.mrb[9].mxu1 }
 0x15d   : > { %1173 = vst [vmem:[%s1767_s9 + $0x10] sm:$0xff] %v1105_v15   ;;  %1181 = vst [vmem:[%s1767_s9 + $0x50] sm:$0xff] %v1145_v16   ;;  %v512_v23 = vadd.f32 %v1744_v24, %v511_v21  ;;  %v576_v25 = vadd.f32 %v1744_v24, %v575_v22  ;;  %v1238_v26 = vpop.f32.mrb[10].mxu0  ;;  %v1254_v27 = vpop.f32.mrb[10].mxu1 }
 0x15e   : > { %v616_v28 = vmax.f32 %v520_v19, 0.0  ;;  %v632_v29 = vmax.f32 %v584_v20, 0.0  ;;  %v523_v30 = vadd.f32 %v1238_v26, %v1744_v24  ;;  %v587_v31 = vadd.f32 %v1254_v27, %v1744_v24  ;;  %v514_v32 = vpop.f32.mrb[11].mxu0  ;;  %v578_v33 = vpop.f32.mrb[11].mxu1 }
 0x15f   : > { %v614_v34 = vmax.f32 %v512_v23, 0.0  ;;  %v630_v35 = vmax.f32 %v576_v25, 0.0  ;;  %v515_v36 = vadd.f32 %v1744_v24, %v514_v32  ;;  %v579_v37 = vadd.f32 %v1744_v24, %v578_v33 }
 0x160   : > { %648 = vst [vmem:[%s1755_s13 + $0x50] sm:$0xff] %v616_v28  ;;  %664 = vst [vmem:[%s1755_s13 + $0xd0] sm:$0xff] %v632_v29  ;;  %v617_v38 = vmax.f32 %v523_v30, 0.0  ;;  %v633_v39 = vmax.f32 %v587_v31, 0.0 }
 0x161   : > { %646 = vst [vmem:[%s1755_s13 + $0x40] sm:$0xff] %v614_v34  ;;  %662 = vst [vmem:[%s1755_s13 + $0xc0] sm:$0xff] %v630_v35  ;;  %v615_v40 = vmax.f32 %v515_v36, 0.0  ;;  %v631_v41 = vmax.f32 %v579_v37, 0.0 }
 0x162   : > { %649 = vst [vmem:[%s1755_s13 + $0x58] sm:$0xff] %v617_v38  ;;  %v1120_v42 = vpack.c.bf16 %v617_v38, %v616_v28  ;;  %665 = vst [vmem:[%s1755_s13 + $0xd8] sm:$0xff] %v633_v39  ;;  %v1160_v43 = vpack.c.bf16 %v633_v39, %v632_v29 }
 0x163   : > { %647 = vst [vmem:[%s1755_s13 + $0x48] sm:$0xff] %v615_v40  ;;  %v1115_v44 = vpack.c.bf16 %v615_v40, %v614_v34  ;;  %663 = vst [vmem:[%s1755_s13 + $0xc8] sm:$0xff] %v631_v41  ;;  %v1155_v45 = vpack.c.bf16 %v631_v41, %v630_v35  ;;  %v1241_v46 = vpop.f32.mrb[12].mxu0  ;;  %v1257_v47 = vpop.f32.mrb[12].mxu1 }
 0x164   : > { %1176 = vst [vmem:[%s1767_s9 + $0x28] sm:$0xff] %v1120_v42   ;;  %1184 = vst [vmem:[%s1767_s9 + $0x68] sm:$0xff] %v1160_v43   ;;  %v536_v48 = vadd.f32 %v1241_v46, %v1744_v24  ;;  %v600_v49 = vadd.f32 %v1257_v47, %v1744_v24  ;;  %v527_v50 = vpop.f32.mrb[13].mxu0  ;;  %v591_v51 = vpop.f32.mrb[13].mxu1 }
 0x165   : > { %1175 = vst [vmem:[%s1767_s9 + $0x20] sm:$0xff] %v1115_v44   ;;  %1183 = vst [vmem:[%s1767_s9 + $0x60] sm:$0xff] %v1155_v45   ;;  %v528_v52 = vadd.f32 %v1744_v24, %v527_v50  ;;  %v592_v53 = vadd.f32 %v1744_v24, %v591_v51  ;;  %v1242_v54 = vpop.f32.mrb[14].mxu0  ;;  %v1258_v55 = vpop.f32.mrb[14].mxu1 }
 0x166   : > { %v620_v56 = vmax.f32 %v536_v48, 0.0  ;;  %v636_v57 = vmax.f32 %v600_v49, 0.0  ;;  %v539_v58 = vadd.f32 %v1242_v54, %v1744_v24  ;;  %v603_v59 = vadd.f32 %v1258_v55, %v1744_v24  ;;  %v530_v60 = vpop.f32.mrb[15].mxu0  ;;  %v594_v61 = vpop.f32.mrb[15].mxu1 }
 0x167   : > { %v618_v62 = vmax.f32 %v528_v52, 0.0  ;;  %v634_v63 = vmax.f32 %v592_v53, 0.0  ;;  %v531_v0 = vadd.f32 %v1744_v24, %v530_v60  ;;  %v595_v1 = vadd.f32 %v1744_v24, %v594_v61 }
 0x168   : > { %652 = vst [vmem:[%s1755_s13 + $0x70] sm:$0xff] %v620_v56  ;;  %668 = vst [vmem:[%s1755_s13 + $0xf0] sm:$0xff] %v636_v57  ;;  %v621_v2 = vmax.f32 %v539_v58, 0.0  ;;  %v637_v3 = vmax.f32 %v603_v59, 0.0 }
 0x169   : > { %650 = vst [vmem:[%s1755_s13 + $0x60] sm:$0xff] %v618_v62  ;;  %666 = vst [vmem:[%s1755_s13 + $0xe0] sm:$0xff] %v634_v63  ;;  %v619_v4 = vmax.f32 %v531_v0, 0.0  ;;  %v635_v5 = vmax.f32 %v595_v1, 0.0 }
 0x16a   : > { %653 = vst [vmem:[%s1755_s13 + $0x78] sm:$0xff] %v621_v2  ;;  %v1130_v24 = vpack.c.bf16 %v621_v2, %v620_v56  ;;  %669 = vst [vmem:[%s1755_s13 + $0xf8] sm:$0xff] %v637_v3  ;;  %v1170_v6 = vpack.c.bf16 %v637_v3, %v636_v57 }
 0x16b   : > { %651 = vst [vmem:[%s1755_s13 + $0x68] sm:$0xff] %v619_v4  ;;  %v1125_v7 = vpack.c.bf16 %v619_v4, %v618_v62  ;;  %667 = vst [vmem:[%s1755_s13 + $0xe8] sm:$0xff] %v635_v5  ;;  %v1165_v8 = vpack.c.bf16 %v635_v5, %v634_v63 }
 0x16c   : > { %1178 = vst [vmem:[%s1767_s9 + $0x38] sm:$0xff] %v1130_v24   ;;  %1186 = vst [vmem:[%s1767_s9 + $0x78] sm:$0xff] %v1170_v6  }
 0x16d   : > { %1438 = shalt.err (!%p1435_p7)
}
 0x16e   : > { %s1439_s13 = scalar_lea.hbm %s1824_s26, 4096  ;;  %s1443_s7 = scalar_lea.hbm %s1920_s3, 8192 }
 0x16f   : > { %p1440_p9 = scmp.ne.s32.totalorder %s1824_s26, %s1439_s13  ;;  %p1444_p5 = scmp.lt.u32.totalorder %s1824_s26, %s1920_s3 }
 0x170   : > { %p1445_p11 = scmp.lt.u32.totalorder %s1443_s7, %s1439_s13  ;;  %p1447_p4 = scmp.lt.u32.totalorder %s1439_s13, %s1824_s26 }
 0x171   : > { %p1441_p1 = pnand %p1440_p9, %p1658_p12 }
 0x172   : > { %p1446_p2 = por %p1445_p11, %p1444_p5 }
 0x173   : > { %p1442_p0 = pneg %p1441_p1 }
 0x174   : > { %p1448_p6 = por %p1447_p4, %p1446_p2 }
 0x176   : > { %p1449_p8 = pnand %p1448_p6, %p1442_p0 }
 0x178   : > { %1452 = shalt.err (!%p1449_p8)
}
 0x179   : > { %s1534_s14 = smov 128   ;;  %s1535_s29 = smov 8   ;;  %1177 = vst [vmem:[%s1767_s9 + $0x30] sm:$0xff] %v1125_v7   ;;  %1185 = vst [vmem:[%s1767_s9 + $0x70] sm:$0xff] %v1165_v8  }
 0x17a   : > { %1281 = dma.vmem_to_hbm [thread:$0]  (%p1658_p12), %s1832_s10, 4096, %s1824_s26, %s831_s5, %s1534_s14, %s1534_s14, %s1535_s29  }
 0x17b   : > { %s836_s21 = scalar_lea.sflag [#allocation9], %s1709_s11  ;;  %s1453_s23 = scalar_lea.vmem %s1843_s25, 2048 }
 0x17c   : > { %p1454_p10 = scmp.ne.s32.totalorder %s1843_s25, %s1453_s23  ;;  %s1536_s12 = smov [#allocation8]  }
 0x17d   : > { %s1457_s13 = sshll.u32 %s1536_s12, 4  ;;  %s1458_s13 = int_to_ptr.vmem [resolvable:$false] %s1457_s13 }
 0x17e   : > { %p1455_p13 = pnand %p1454_p10, %p1658_p12  ;;  %s1459_s28 = scalar_lea.vmem %s1458_s13, 4096 }
 0x17f   : > { %p1460_p7 = scmp.lt.s32.totalorder %s1843_s25, %s1458_s13  ;;  %p1461_p9 = scmp.lt.s32.totalorder %s1459_s28, %s1453_s23 }
 0x180   : > { %p1456_p3 = pneg %p1455_p13 }
 0x181   : > { %p1462_p1 = por %p1461_p9, %p1460_p7 }
 0x183   : > { %p1463_p0 = pnand %p1462_p1, %p1456_p3 }
 0x185   : > { %1466 = shalt.err (!%p1463_p0)
}
 0x186   : > { %s1467_s9 = scalar_lea.hbm %s1841_s20, 2048  ;;  %s1471_s5 = scalar_lea.hbm %s1921_s4, 4096 }
 0x187   : > { %p1468_p5 = scmp.ne.s32.totalorder %s1841_s20, %s1467_s9  ;;  %p1472_p4 = scmp.lt.u32.totalorder %s1841_s20, %s1921_s4 }
 0x188   : > { %p1473_p6 = scmp.lt.u32.totalorder %s1471_s5, %s1467_s9  ;;  %p1475_p10 = scmp.lt.u32.totalorder %s1467_s9, %s1841_s20 }
 0x189   : > { %p1469_p11 = pnand %p1468_p5, %p1658_p12 }
 0x18a   : > { %p1474_p8 = por %p1473_p6, %p1472_p4 }
 0x18b   : > { %p1470_p2 = pneg %p1469_p11 }
 0x18c   : > { %p1476_p13 = por %p1475_p10, %p1474_p8 }
 0x18e   : > { %p1477_p3 = pnand %p1476_p13, %p1470_p2 }
 0x190   : > { %1480 = shalt.err (!%p1477_p3)
}
 0x191   : > { %s1537_s8 = smov 64   ;;  %s1538_s19 = smov 4  }
 0x192   : > { %1282 = dma.vmem_to_hbm [thread:$0]  (%p1658_p12), %s1843_s25, 2048, %s1841_s20, %s836_s21, %s1537_s8, %s1537_s8, %s1538_s19  }
 0x193 PF: > { %s880_s14 = sand.u32 1, %s1515_s15   ;;  %p1936_p7 = scmp.ne.s32.totalorder %s1926_s22, 0 }
 0x194   : > { %p1937_p9 = scmp.ge.s32.totalorder %s1527_s18, 2  ;;  %s881_s29 = scalar_lea.sflag [#allocation4], %s880_s14 }
 0x196   : > { %p1294_p1 = pnand %p1937_p9, %p1936_p7 }
 0x198   : > { %1506 = dma.done.wait (!%p1294_p1), %s881_s29, 4096  }
 0x199   : > { %1508 = vsyncadd (!%p1294_p1), %s881_s29, 4294963200  ;;  %s890_s23 = scalar_lea.sflag [#allocation9], %s880_s14 }
 0x19a   : > { %1510 = dma.done.wait (!%p1294_p1), %s890_s23, 2048  }
 0x19b   : > { %1512 = vsyncadd (!%p1294_p1), %s890_s23, 4294965248  ;;  %p22_p12 = scmp.ge.s32.totalorder %s1620_s27, 4   ;;  %s1938_s15 = smov %s1519_s16 }
 0x19c   : > { %s1939_s16 = smov %s1523_s17  ;;  %s1940_s17 = smov %s1654_s24 }
 0x19d   : > { %s1941_s18 = smov %s1620_s27  ;;  %24 = sbr.rel (!%p22_p12) target bundleno = 8 (0x8), region = 98 }
 0x1a4   :  { %895 = vsyncpa [#allocation3], 1 }
 0x1a5   :  { %897 = vsyncpa [#allocation3 + $0x1], 1 }
 0x1a6   :  { %898 = vsyncpa [#allocation6], 1 }
 0x1a7   :  { %899 = vsyncpa [#allocation4], 1 }
 0x1a8   :  { %901 = vsyncpa [#allocation4 + $0x1], 1 }
 0x1a9   :  { %902 = vsyncpa [#allocation9], 1 }
 0x1aa   :  { %904 = vsyncpa [#allocation9 + $0x1], 1 }

</bundles_post_ra>
